<compile_context>
chip_gen: v7x
topology: tpu7x:2x2x1
jax: 0.10.0
libtpu: 0.0.40
codegen_flags: <defaults>
</compile_context>

<pallas_src>
import functools

import jax
import jax.numpy as jnp
from jax.experimental import pallas as pl
from jax.experimental.pallas import tpu as pltpu

_MAX_SEGMENTS = 256                 # cap on the statically unrolled 128-lane loop
_TS_CAP = _MAX_SEGMENTS * 128       # => sz tiles of at most 32768 elements


def _vmem_capacity_bytes():
    """Physical VMEM per TensorCore; conservative default if the query fails."""
    try:
        info = pltpu.get_tpu_info()
        cap = getattr(info, "vmem_capacity_bytes", None) or getattr(info, "vmem_bytes", None)
        if cap:
            return int(cap)
    except Exception:
        pass
    return 64 * 1024 * 1024         # v7x per-core VMEM (the smallest generation)


# ----------------------------------------------------------------------------
# Kernels
# ----------------------------------------------------------------------------
def _fused_kernel(x_ref, gamma_ref, beta_ref, ref_mean_ref, ref_var_ref,
                  mean_ref, var_ref, y_ref, *, eps, c1, c2, n):
    """Whole-array-resident path: stats + normalize in one kernel (2x HBM traffic)."""
    x = x_ref[...].astype(jnp.float32)                            # (bs, c, sz)
    s = jnp.sum(jnp.sum(x, axis=-1, keepdims=True), axis=0)       # (c, 1)
    ss = jnp.sum(jnp.sum(x * x, axis=-1, keepdims=True), axis=0)  # (c, 1)
    mean = s * (1.0 / n)
    # TODO(synk): E[x^2]-E[x]^2 in f32 is cancellation-prone when |mean|>>std;
    # a shifted/Welford formulation would be more robust.  Clamp keeps var >= 0.
    var = jnp.maximum((ss - n * mean * mean) * (1.0 / max(n - 1.0, 1.0)), 0.0)
    use_mean = mean * c1 + ref_mean_ref[...] * c2
    use_var = var * c1 + ref_var_ref[...] * c2
    inv = 1.0 / (use_var + eps)          # module divides by (var + eps); no sqrt
    scale = gamma_ref[...] * inv
    shift = beta_ref[...] - use_mean * scale
    mean_ref[...] = mean
    var_ref[...] = var
    y_ref[...] = (x * scale + shift).astype(y_ref.dtype)


def _stats_kernel(x_ref, rsum_ref, rssq_ref, sum_acc, ssq_acc, *, ts):
    """Per-row sum / sum-of-squares over sz tiles, lane-parallel accumulation."""
    s = pl.program_id(2)

    @pl.when(s == 0)
    def _():
        sum_acc[...] = jnp.zeros_like(sum_acc)
        ssq_acc[...] = jnp.zeros_like(ssq_acc)

    nseg, rem = ts // 128, ts % 128
    acc_s = sum_acc[...]
    acc_q = ssq_acc[...]
    for j in range(nseg):                 # static unroll: VALU-only adds per vreg
        seg = x_ref[:, j * 128:(j + 1) * 128].astype(jnp.float32)
        acc_s = acc_s + seg
        acc_q = acc_q + seg * seg
    sum_acc[...] = acc_s
    ssq_acc[...] = acc_q
    if rem:                               # only when ts == full, non-128-multiple sz
        tail = x_ref[:, nseg * 128:ts].astype(jnp.float32)
        sum_acc[:, :1] = sum_acc[:, :1] + jnp.sum(tail, axis=-1, keepdims=True)
        ssq_acc[:, :1] = ssq_acc[:, :1] + jnp.sum(tail * tail, axis=-1, keepdims=True)

    @pl.when(s == pl.num_programs(2) - 1)
    def _():
        # Single cross-lane (XLU) reduce per row block, only at the very end.
        rsum_ref[...] = jnp.sum(sum_acc[...], axis=-1, keepdims=True)[None]
        rssq_ref[...] = jnp.sum(ssq_acc[...], axis=-1, keepdims=True)[None]


def _normalize_kernel(x_ref, scale_ref, shift_ref, y_ref):
    """y = x * scale + shift with per-row (TR, 1) scale/shift broadcast."""
    x = x_ref[...].astype(jnp.float32)
    y_ref[...] = (x * scale_ref[...] + shift_ref[...]).astype(y_ref.dtype)


# ----------------------------------------------------------------------------
# Tiling plan for the streaming path
# ----------------------------------------------------------------------------
def _divisors(n, step, cap):
    """Divisors of n that are multiples of `step` (plus n itself if <= cap), desc."""
    ds = set()
    if n <= cap:
        ds.add(n)
    d = step
    while d <= min(n // 2, cap):
        if n % d == 0:
            ds.add(d)
        d += step
    return sorted(ds, reverse=True)


def _search(rows, sz, itemsize, target_bytes, vmem_limit):
    sz_div = _divisors(sz, 128, _TS_CAP)
    row_div = _divisors(rows, 8, rows)
    if not sz_div or not row_div:
        return None
    for ts in sz_div:                      # widest lane-dense tile first
        for tr in row_div:                 # then as many rows as still fit
            if tr * ts * itemsize <= target_bytes:
                return tr, ts
    tr, ts = min(row_div), min(sz_div)     # smallest legal block
    if tr * ts * itemsize <= max(target_bytes, vmem_limit // 4):
        return tr, ts
    return None


def _plan(rows, sz, itemsize, target_bytes, vmem_limit):
    """Returns (rows_pad, sz_pad, TR, TS).  Pads only when no aligned tiling exists."""
    got = _search(rows, sz, itemsize, target_bytes, vmem_limit)
    if got is not None:
        return rows, sz, got[0], got[1]
    # Zero-pad so dense (mult-of-8, mult-of-128) tiles exist.  Zero padding does
    # not change sum / sum-of-squares and padded rows/cols are sliced off later.
    r_pad = -(-rows // 8) * 8
    s_pad = -(-sz // 128) * 128
    got = _search(r_pad, s_pad, itemsize, target_bytes, vmem_limit)
    if got is None:
        got = (8, 128)
    return r_pad, s_pad, got[0], got[1]


# ----------------------------------------------------------------------------
# Public wrapper
# ----------------------------------------------------------------------------
def virtual_batchnorm_1d(x, gamma, beta, ref_mean=None, ref_var=None, eps=1e-8,
                         max_fused_bytes=None, block_bytes=None):
    """Matches VirtualBatchnorm1D.forward.

    x: (bs, c, sz).  Returns (mean, var, out) when ref stats are None (reference
    pass), else returns out.  Note: requires bs * sz >= 2 for a meaningful
    unbiased variance (the denominator is clamped otherwise).
    """
    bs, c, sz = x.shape
    n = bs * sz
    return_ref = ref_mean is None or ref_var is None

    gamma_f = jnp.reshape(gamma, (c,)).astype(jnp.float32)
    beta_f = jnp.reshape(beta, (c,)).astype(jnp.float32)
    if return_ref:
        c1, c2 = 1.0, 0.0
        rm = jnp.zeros((c,), jnp.float32)
        rv = jnp.zeros((c,), jnp.float32)
    else:
        c1 = 1.0 / (1.0 + bs)
        c2 = 1.0 - c1
        rm = jnp.reshape(ref_mean, (c,)).astype(jnp.float32)
        rv = jnp.reshape(ref_var, (c,)).astype(jnp.float32)

    itemsize = jnp.dtype(x.dtype).itemsize
    x_bytes = bs * c * sz * itemsize
    cap = _vmem_capacity_bytes()
    if max_fused_bytes is None:
        # x resident + y + f32 temporaries ~= 4-6x x_bytes; stay well inside VMEM.
        max_fused_bytes = min(cap // 8, 16 << 20)

    # -------- fused single-pass path (small/medium inputs) --------
    if 0 < x_bytes <= max_fused_bytes:
        mean2, var2, y = pl.pallas_call(
            functools.partial(_fused_kernel, eps=float(eps), c1=c1, c2=c2, n=float(n)),
            out_shape=(
                jax.ShapeDtypeStruct((c, 1), jnp.float32),
                jax.ShapeDtypeStruct((c, 1), jnp.float32),
                jax.ShapeDtypeStruct((bs, c, sz), x.dtype),
            ),
            compiler_params=pltpu.CompilerParams(
                vmem_limit_bytes=int(min(cap * 3 // 4, 96 << 20))),
        )(x, gamma_f.reshape(c, 1), beta_f.reshape(c, 1),
          rm.reshape(c, 1), rv.reshape(c, 1))
        mean, var = mean2[:, 0], var2[:, 0]
        return (mean, var, y) if return_ref else y

    # -------- streaming two-pass path (large inputs) --------
    R = bs * c
    x2 = x.reshape(R, sz)                       # free: contiguous reshape
    vmem_limit = int(min(cap // 2, 64 << 20))
    if block_bytes is None:
        # total/8 keeps >= ~8 pipelined grid steps; clamp to the 1-4 MiB sweet spot.
        block_bytes = int(min(4 << 20, max(1 << 20, x_bytes // 8)))
    R_pad, sz_pad, TR, TS = _plan(R, sz, itemsize, block_bytes, vmem_limit)
    if (R_pad, sz_pad) != (R, sz):
        x2 = jnp.pad(x2, ((0, R_pad - R), (0, sz_pad - sz)))

    RB = R_pad // TR
    SB_total = sz_pad // TS
    # v7x: if there is only one row block, split the sz reduction across the two
    # TensorCores via an extra leading "parallel" axis (harmless on v5e/v6e).
    nsplit = 2 if (RB == 1 and SB_total % 2 == 0 and SB_total >= 4) else 1
    SB = SB_total // nsplit

    # Pass 1: per-row sum / sum-of-squares (lane-parallel accumulation).
    rsum, rssq = pl.pallas_call(
        functools.partial(_stats_kernel, ts=TS),
        out_shape=(
            jax.ShapeDtypeStruct((nsplit, R_pad, 1), jnp.float32),
            jax.ShapeDtypeStruct((nsplit, R_pad, 1), jnp.float32),
        ),
        grid=(nsplit, RB, SB),
        in_specs=[pl.BlockSpec((TR, TS), lambda p, r, s: (r, p * SB + s))],
        out_specs=(
            pl.BlockSpec((1, TR, 1), lambda p, r, s: (p, r, 0)),
            pl.BlockSpec((1, TR, 1), lambda p, r, s: (p, r, 0)),
        ),
        scratch_shapes=[pltpu.VMEM((TR, 128), jnp.float32),
                        pltpu.VMEM((TR, 128), jnp.float32)],
        compiler_params=pltpu.CompilerParams(
            dimension_semantics=("parallel", "parallel", "arbitrary"),
            vmem_limit_bytes=vmem_limit),
    )(x2)

    # Tiny O(bs*c) finalize in XLA: fold batch, blend with reference stats and
    # fuse gamma/beta into one per-row (scale, shift) pair.
    row_sum = jnp.sum(rsum, axis=0)[:R, 0]
    row_ssq = jnp.sum(rssq, axis=0)[:R, 0]
    ch_sum = row_sum.reshape(bs, c).sum(axis=0)
    ch_ssq = row_ssq.reshape(bs, c).sum(axis=0)
    nf = float(n)
    mean = ch_sum / nf
    # TODO(synk): shifted/Welford variance would be more robust for |mean|>>std.
    var = jnp.maximum((ch_ssq - nf * mean * mean) / max(nf - 1.0, 1.0), 0.0)
    use_mean = mean * c1 + rm * c2
    use_var = var * c1 + rv * c2
    scale = gamma_f / (use_var + eps)           # module divides by (var + eps); no sqrt
    shift = beta_f - use_mean * scale
    row_scale = jnp.tile(scale, bs).reshape(R, 1)
    row_shift = jnp.tile(shift, bs).reshape(R, 1)
    if R_pad != R:
        row_scale = jnp.pad(row_scale, ((0, R_pad - R), (0, 0)))
        row_shift = jnp.pad(row_shift, ((0, R_pad - R), (0, 0)))

    # Pass 2: y = x * scale + shift, fully parallel lane-dense tiles.
    y2 = pl.pallas_call(
        _normalize_kernel,
        out_shape=jax.ShapeDtypeStruct((R_pad, sz_pad), x.dtype),
        grid=(RB, SB_total),
        in_specs=[pl.BlockSpec((TR, TS), lambda r, s: (r, s)),
                  pl.BlockSpec((TR, 1), lambda r, s: (r, 0)),
                  pl.BlockSpec((TR, 1), lambda r, s: (r, 0))],
        out_specs=pl.BlockSpec((TR, TS), lambda r, s: (r, s)),
        compiler_params=pltpu.CompilerParams(
            dimension_semantics=("parallel", "parallel"),
            vmem_limit_bytes=vmem_limit),
    )(x2, row_scale, row_shift)

    y = y2[:R, :sz].reshape(bs, c, sz)
    return (mean, var, y) if return_ref else y


# ----------------------------------------------------------------------------
# Pure-JAX reference (mirrors the PyTorch module) and self-test
# ----------------------------------------------------------------------------
def _reference(x, gamma, beta, ref_mean=None, ref_var=None, eps=1e-8):
    bs, c, sz = x.shape
    out = jnp.transpose(x, (0, 2, 1)).reshape(-1, c)
    mean = jnp.mean(out, axis=0)
    var = jnp.var(out, axis=0, ddof=1)
    if ref_mean is None or ref_var is None:
        use_mean, use_var = mean, var
    else:
        c1 = 1.0 / (1.0 + bs)
        c2 = 1.0 - c1
        use_mean = mean * c1 + ref_mean * c2
        use_var = var * c1 + ref_var * c2
    out = (out - use_mean) / (use_var + eps)
    out = out * gamma + beta
    out = jnp.transpose(out.reshape(bs, sz, c), (0, 2, 1))
    if ref_mean is None or ref_var is None:
        return mean, var, out
    return out


if __name__ == "__main__":
    key = jax.random.PRNGKey(0)
    k1, k2, k3, k4, k5, kg = jax.random.split(key, 6)

    # ---- small shapes through the fused single-pass path ----
    bs, c, sz = 2, 4, 16
    x_a = jax.random.normal(k1, (bs, c, sz), jnp.float32)
    x_b = jax.random.normal(k2, (bs, c, sz), jnp.float32)
    gamma = jax.random.uniform(kg, (c,), jnp.float32)        # module init: U(0,1)
    beta = jnp.zeros((c,), jnp.float32)                      # module init: 0

    rm, rv, y_a = virtual_batchnorm_1d(x_a, gamma, beta)     # reference pass
    jax.block_until_ready((rm, rv, y_a))
    y_b = virtual_batchnorm_1d(x_b, gamma, beta, rm, rv)     # virtual pass
    jax.block_until_ready(y_b)

    rm_r, rv_r, y_a_r = _reference(x_a, gamma, beta)
    y_b_r = _reference(x_b, gamma, beta, rm_r, rv_r)
    assert jnp.allclose(rm, rm_r, atol=1e-5), "fused ref_mean mismatch"
    assert jnp.allclose(rv, rv_r, atol=1e-5), "fused ref_var mismatch"
    assert jnp.allclose(y_a, y_a_r, atol=1e-4), "fused reference-pass output mismatch"
    assert jnp.allclose(y_b, y_b_r, atol=1e-4), "fused virtual-pass output mismatch"

    # ---- streaming path: multi-block rows & sz (exercises accumulator carry) ----
    bs3, c3, sz3 = 2, 8, 2048
    x3 = jax.random.normal(k3, (bs3, c3, sz3), jnp.float32)
    g3 = jax.random.uniform(jax.random.fold_in(kg, 1), (c3,), jnp.float32)
    b3 = 0.1 * jax.random.normal(jax.random.fold_in(kg, 2), (c3,), jnp.float32)
    rm3, rv3, y3 = virtual_batchnorm_1d(x3, g3, b3,
                                        max_fused_bytes=0, block_bytes=16 * 1024)
    y3b = virtual_batchnorm_1d(x3, g3, b3, rm3, rv3,
                               max_fused_bytes=0, block_bytes=16 * 1024)
    jax.block_until_ready((y3, y3b))
    rm3_r, rv3_r, y3_r = _reference(x3, g3, b3)
    y3b_r = _reference(x3, g3, b3, rm3_r, rv3_r)
    assert jnp.allclose(rm3, rm3_r, atol=1e-5), "stream ref_mean mismatch"
    assert jnp.allclose(rv3, rv3_r, atol=1e-4), "stream ref_var mismatch"
    assert jnp.allclose(y3, y3_r, atol=1e-4), "stream reference-pass output mismatch"
    assert jnp.allclose(y3b, y3b_r, atol=1e-4), "stream virtual-pass output mismatch"

    # ---- streaming path, single row block: exercises the 2-way sz split ----
    bs4, c4, sz4 = 2, 4, 2048
    x4 = jax.random.normal(k4, (bs4, c4, sz4), jnp.float32)
    g4 = jax.random.uniform(jax.random.fold_in(kg, 3), (c4,), jnp.float32)
    b4 = jnp.zeros((c4,), jnp.float32)
    rm4, rv4, y4 = virtual_batchnorm_1d(x4, g4, b4,
                                        max_fused_bytes=0, block_bytes=16 * 1024)
    jax.block_until_ready(y4)
    rm4_r, rv4_r, y4_r = _reference(x4, g4, b4)
    assert jnp.allclose(rm4, rm4_r, atol=1e-5), "split ref_mean mismatch"
    assert jnp.allclose(rv4, rv4_r, atol=1e-4), "split ref_var mismatch"
    assert jnp.allclose(y4, y4_r, atol=1e-4), "split output mismatch"

    # ---- streaming path with sz not a multiple of 128: exercises the tail path ----
    bs5, c5, sz5 = 2, 4, 200
    x5 = jax.random.normal(k5, (bs5, c5, sz5), jnp.float32)
    g5 = jax.random.uniform(jax.random.fold_in(kg, 4), (c5,), jnp.float32)
    b5 = jnp.zeros((c5,), jnp.float32)
    rm5, rv5, y5 = virtual_batchnorm_1d(x5, g5, b5, max_fused_bytes=0)
    jax.block_until_ready(y5)
    rm5_r, rv5_r, y5_r = _reference(x5, g5, b5)
    assert jnp.allclose(rm5, rm5_r, atol=1e-5), "tail ref_mean mismatch"
    assert jnp.allclose(rv5, rv5_r, atol=1e-4), "tail ref_var mismatch"
    assert jnp.allclose(y5, y5_r, atol=1e-4), "tail output mismatch"

    print("KERNEL_OK")
</pallas_src>

<mosaic_0001>
module attributes {stable_mosaic.version = 11 : i64} {
  func.func @_fused_kernel(%arg0: memref<2x4x16xf32, #tpu.memory_space<vmem>>, %arg1: memref<4x1xf32, #tpu.memory_space<vmem>>, %arg2: memref<4x1xf32, #tpu.memory_space<vmem>>, %arg3: memref<4x1xf32, #tpu.memory_space<vmem>>, %arg4: memref<4x1xf32, #tpu.memory_space<vmem>>, %arg5: memref<4x1xf32, #tpu.memory_space<vmem>>, %arg6: memref<4x1xf32, #tpu.memory_space<vmem>>, %arg7: memref<2x4x16xf32, #tpu.memory_space<vmem>>) attributes {dimension_semantics = [], scalar_prefetch = 0 : i64, scratch_operands = 0 : i64, tpu.core_type = #tpu.core_type<tc>} {
    %c0 = arith.constant 0 : index
    %c0_0 = arith.constant 0 : index
    %c0_1 = arith.constant 0 : index
    %0 = vector.load %arg0[%c0, %c0_0, %c0_1] : memref<2x4x16xf32, #tpu.memory_space<vmem>>, vector<2x4x16xf32>
    %cst = arith.constant dense<0.000000e+00> : vector<2x4xf32>
    %1 = vector.multi_reduction <add>, %0, %cst [2] : vector<2x4x16xf32> to vector<2x4xf32>
    %2 = vector.shape_cast %1 : vector<2x4xf32> to vector<2x4x1xf32>
    %cst_2 = arith.constant dense<0.000000e+00> : vector<4x1xf32>
    %3 = vector.multi_reduction <add>, %2, %cst_2 [0] : vector<2x4x1xf32> to vector<4x1xf32>
    %4 = arith.mulf %0, %0 : vector<2x4x16xf32>
    %cst_3 = arith.constant dense<0.000000e+00> : vector<2x4xf32>
    %5 = vector.multi_reduction <add>, %4, %cst_3 [2] : vector<2x4x16xf32> to vector<2x4xf32>
    %6 = vector.shape_cast %5 : vector<2x4xf32> to vector<2x4x1xf32>
    %cst_4 = arith.constant dense<0.000000e+00> : vector<4x1xf32>
    %7 = vector.multi_reduction <add>, %6, %cst_4 [0] : vector<2x4x1xf32> to vector<4x1xf32>
    %cst_5 = arith.constant 3.125000e-02 : f32
    %8 = vector.broadcast %cst_5 : f32 to vector<4x1xf32>
    %9 = arith.mulf %3, %8 : vector<4x1xf32>
    %cst_6 = arith.constant 3.200000e+01 : f32
    %10 = vector.broadcast %cst_6 : f32 to vector<4x1xf32>
    %11 = arith.mulf %10, %9 : vector<4x1xf32>
    %12 = arith.mulf %11, %9 : vector<4x1xf32>
    %13 = arith.subf %7, %12 : vector<4x1xf32>
    %cst_7 = arith.constant 0.0322580636 : f32
    %14 = vector.broadcast %cst_7 : f32 to vector<4x1xf32>
    %15 = arith.mulf %13, %14 : vector<4x1xf32>
    %cst_8 = arith.constant 0.000000e+00 : f32
    %16 = vector.broadcast %cst_8 : f32 to vector<4x1xf32>
    %17 = arith.maximumf %15, %16 : vector<4x1xf32>
    %cst_9 = arith.constant 1.000000e+00 : f32
    %18 = vector.broadcast %cst_9 : f32 to vector<4x1xf32>
    %19 = arith.mulf %9, %18 : vector<4x1xf32>
    %c0_10 = arith.constant 0 : index
    %c0_11 = arith.constant 0 : index
    %20 = vector.load %arg3[%c0_10, %c0_11] : memref<4x1xf32, #tpu.memory_space<vmem>>, vector<4x1xf32>
    %cst_12 = arith.constant 0.000000e+00 : f32
    %21 = vector.broadcast %cst_12 : f32 to vector<4x1xf32>
    %22 = arith.mulf %20, %21 : vector<4x1xf32>
    %23 = arith.addf %19, %22 : vector<4x1xf32>
    %cst_13 = arith.constant 1.000000e+00 : f32
    %24 = vector.broadcast %cst_13 : f32 to vector<4x1xf32>
    %25 = arith.mulf %17, %24 : vector<4x1xf32>
    %c0_14 = arith.constant 0 : index
    %c0_15 = arith.constant 0 : index
    %26 = vector.load %arg4[%c0_14, %c0_15] : memref<4x1xf32, #tpu.memory_space<vmem>>, vector<4x1xf32>
    %cst_16 = arith.constant 0.000000e+00 : f32
    %27 = vector.broadcast %cst_16 : f32 to vector<4x1xf32>
    %28 = arith.mulf %26, %27 : vector<4x1xf32>
    %29 = arith.addf %25, %28 : vector<4x1xf32>
    %cst_17 = arith.constant 9.99999993E-9 : f32
    %30 = vector.broadcast %cst_17 : f32 to vector<4x1xf32>
    %31 = arith.addf %29, %30 : vector<4x1xf32>
    %cst_18 = arith.constant 1.000000e+00 : f32
    %32 = vector.broadcast %cst_18 : f32 to vector<4x1xf32>
    %33 = arith.divf %32, %31 : vector<4x1xf32>
    %c0_19 = arith.constant 0 : index
    %c0_20 = arith.constant 0 : index
    %34 = vector.load %arg1[%c0_19, %c0_20] : memref<4x1xf32, #tpu.memory_space<vmem>>, vector<4x1xf32>
    %35 = arith.mulf %34, %33 : vector<4x1xf32>
    %c0_21 = arith.constant 0 : index
    %c0_22 = arith.constant 0 : index
    %36 = vector.load %arg2[%c0_21, %c0_22] : memref<4x1xf32, #tpu.memory_space<vmem>>, vector<4x1xf32>
    %37 = arith.mulf %23, %35 : vector<4x1xf32>
    %38 = arith.subf %36, %37 : vector<4x1xf32>
    %c0_23 = arith.constant 0 : index
    %c0_24 = arith.constant 0 : index
    %39 = vector.load %arg5[%c0_23, %c0_24] : memref<4x1xf32, #tpu.memory_space<vmem>>, vector<4x1xf32>
    tpu.vector_store %arg5[%c0_23, %c0_24], %9 {strides = array<i32>} : memref<4x1xf32, #tpu.memory_space<vmem>>, vector<4x1xf32>,
    %c0_25 = arith.constant 0 : index
    %c0_26 = arith.constant 0 : index
    %40 = vector.load %arg6[%c0_25, %c0_26] : memref<4x1xf32, #tpu.memory_space<vmem>>, vector<4x1xf32>
    tpu.vector_store %arg6[%c0_25, %c0_26], %17 {strides = array<i32>} : memref<4x1xf32, #tpu.memory_space<vmem>>, vector<4x1xf32>,
    %41 = vector.shape_cast %35 : vector<4x1xf32> to vector<1x4x1xf32>
    %42 = vector.broadcast %41 : vector<1x4x1xf32> to vector<2x4x16xf32>
    %43 = arith.mulf %0, %42 : vector<2x4x16xf32>
    %44 = vector.shape_cast %38 : vector<4x1xf32> to vector<1x4x1xf32>
    %45 = vector.broadcast %44 : vector<1x4x1xf32> to vector<2x4x16xf32>
    %46 = arith.addf %43, %45 : vector<2x4x16xf32>
    %c0_27 = arith.constant 0 : index
    %c0_28 = arith.constant 0 : index
    %c0_29 = arith.constant 0 : index
    %47 = vector.load %arg7[%c0_27, %c0_28, %c0_29] : memref<2x4x16xf32, #tpu.memory_space<vmem>>, vector<2x4x16xf32>
    tpu.vector_store %arg7[%c0_27, %c0_28, %c0_29], %46 {strides = array<i32>} : memref<2x4x16xf32, #tpu.memory_space<vmem>>, vector<2x4x16xf32>,
    return
  }
}

</mosaic_0001>

<bundles_post_ra>
// kernel: tpu_custom_call.1
= control target key start
LH: loop header
LB: loop body
LE: loop exit
PB: predicated region body
PF: predicated region fallthrough
CT: control target
= control target key end

     0   :  { %vm26_vm0 = vcmask 125952   ;;  %s229_s0 = inlined_call_operand.vmem [shape: f32[2,4,16], index: 0, kind: input, shape index: {}]   ;;  %s230_s1 = inlined_call_operand.vmem [shape: f32[4,1], index: 1, kind: input, shape index: {}]   ;;  %s231_s2 = inlined_call_operand.vmem [shape: f32[4,1], index: 2, kind: input, shape index: {}]   ;;  %s232_s3 = inlined_call_operand.vmem [shape: f32[4,1], index: 3, kind: input, shape index: {}]   ;;  %s233_s4 = inlined_call_operand.vmem [shape: f32[4,1], index: 4, kind: input, shape index: {}]   ;;  %s234_s5 = inlined_call_operand.vmem [shape: f32[4,1], index: 5, kind: output, shape index: {0}]   ;;  %s235_s6 = inlined_call_operand.vmem [shape: f32[4,1], index: 6, kind: output, shape index: {1}]   ;;  %s236_s7 = inlined_call_operand.hbm [shape: f32[2,4,16], index: 7, kind: output, shape index: {2}]  }
   0x1   :  { %v24_v0 = vld [vmem:[%s229_s0] sm:$0xf]  ;;  %v25_v1 = vld [vmem:[%s229_s0 + $0x4] sm:$0xf] }
   0x2   :  { %v27_v2 = vsel %vm26_vm0, %v24_v0, 0.0  ;;  %v37_v3 = vmul.f32 %v24_v0, %v24_v0  ;;  %v38_v4 = vmul.f32 %v25_v1, %v25_v1 }
   0x3   :  { %13 = vsyncpa [#allocation3], 0  ;;  %28 = vadd.xlane.f32.xlu0 %v27_v2  ;;  %v30_v6 = vsel %vm26_vm0, %v25_v1, 0.0  ;;  %v143_v8 = vmov 0   ;;  %vm33_vm1 = vcmask 1043456   ;;  %vm68_vm2 = vcmask 3072  }
   0x4   :  { %v39_v5 = vsel %vm26_vm0, %v37_v3, 0.0  ;;  %v42_v7 = vsel %vm26_vm0, %v38_v4, 0.0  ;;  %115 = vset.pattern.permute.xlu0 %v143_v8  ;;  %116 = vset.pattern.permute.xlu1 %v143_v8  ;;  %v57_v22 = vld [vmem:[%s233_s4] sm:$0xf] }
   0x5   :  { %40 = vadd.xlane.f32.xlu1 %v39_v5  ;;  %v58_v24 = vmul.f32 0.0, %v57_v22  ;;  %v54_v29 = vld [vmem:[%s232_s3] sm:$0xf] }
   0x6   :  { %v55_v30 = vmul.f32 0.0, %v54_v29  ;;  %v63_v31 = vld [vmem:[%s230_s1] sm:$0xf] }
   0x7   :  { %31 = vadd.xlane.f32.xlu0 %v30_v6  ;;  %v65_v35 = vld [vmem:[%s231_s2] sm:$0xf] }
   0x9   :  { %43 = vadd.xlane.f32.xlu1 %v42_v7 }
  0x90   :  { %v29_v9 = vpop.xlane.xlu0 %28 }
  0x91   :  { %v34_v12 = vsel %vm33_vm1, %v29_v9, 0.0 }
  0x92   :  { %v41_v10 = vpop.xlane.xlu1 %40 }
  0x93   :  { %v45_v17 = vsel %vm33_vm1, %v41_v10, 0.0 }
  0x94   :  { %v32_v11 = vpop.xlane.xlu0 %31 }
  0x95   :  { %v35_v13 = vsel %vm33_vm1, %v32_v11, 0.0 }
  0x96   :  { %v36_v14 = vadd.f32 %v35_v13, %v34_v12  ;;  %v44_v15 = vpop.xlane.xlu1 %43 }
  0x97   :  { %v46_v18 = vsel %vm33_vm1, %v44_v15, 0.0 }
  0x98   :  { %v48_v16 = vmul.f32 0.03125, %v36_v14  ;;  %v47_v20 = vadd.f32 %v46_v18, %v45_v17 }
  0x9a   :  { %v49_v19 = vmul.f32 32.0, %v48_v16  ;;  %69 = vst.msk [vmem:[%s234_s5] sm:$0xf] %vm68_vm2, %v48_v16  ;;  %v56_v34 = vadd.f32 %v55_v30, %v48_v16 }
  0x9c   :  { %v50_v21 = vmul.f32 %v49_v19, %v48_v16 }
  0x9e   :  { %v51_v23 = vsub.f32 %v47_v20, %v50_v21 }
  0xa0   :  { %v52_v25 = vmul.f32 0.032258064, %v51_v23 }
  0xa2   :  { %v53_v26 = vmax.f32 %v52_v25, 0.0 }
  0xa4   :  { %v59_v27 = vadd.f32 %v58_v24, %v53_v26  ;;  %70 = vst.msk [vmem:[%s235_s6] sm:$0xf] %vm68_vm2, %v53_v26  ;;  %s144_s6 = smov [#allocation2]  }
  0xa5   :  { %s96_s14 = sshll.u32 %s144_s6, 4  ;;  %s97_s14 = int_to_ptr.vmem [resolvable:$true] %s96_s14 }
  0xa6   :  { %v60_v28 = vadd.f32 1e-08, %v59_v27  ;;  %s119_s1 = scalar_lea.vmem %s97_s14, 128  ;;  %p124_p1 = scmp.lt.s32.totalorder %s97_s14, %s97_s14 }
  0xa7   :  { %p120_p0 = scmp.ne.s32.totalorder %s97_s14, %s119_s1  ;;  %p125_p2 = scmp.lt.s32.totalorder %s119_s1, %s119_s1 }
  0xa8   :  { %117 = vrcp.f32 %v60_v28 }
  0xa9   :  { %p126_p3 = por %p125_p2, %p124_p1 }
  0xab   :  { %p127_p4 = pnand %p126_p3, %p120_p0 }
  0xb2   :  { %v118_v32 = vpop.eup %117 }
  0xb3   :  { %v64_v33 = vmul.f32 %v118_v32, %v63_v31 }
  0xb5   :  { %73 = vperm.xlu0 %115, %v64_v33   ;;  %v66_v36 = vmul.f32 %v64_v33, %v56_v34 }
  0xb7   :  { %v67_v37 = vsub.f32 %v65_v35, %v66_v36 }
  0xb9   :  { %80 = vperm.xlu1 %116, %v67_v37  }
 0x134   :  { %v74_v38 = vpop.permute.xlu0 %73 }
 0x135   :  { %v76_v39 = vmul.f32 %v74_v38, %v24_v0  ;;  %v77_v40 = vmul.f32 %v74_v38, %v25_v1 }
 0x138   :  { %v81_v41 = vpop.permute.xlu1 %80 }
 0x139   :  { %v83_v42 = vadd.f32 %v81_v41, %v76_v39  ;;  %v84_v43 = vadd.f32 %v81_v41, %v77_v40 }
 0x13b   :  { %85 = vst.msk [vmem:[#allocation2] sm:$0xf] %vm26_vm0, %v83_v42  ;;  %86 = vst.msk [vmem:[#allocation2 + $0x4] sm:$0xf] %vm26_vm0, %v84_v43 }
 0x13c   :  { %130 = shalt.err (!%p127_p4)
}
 0x13d   :  { %s131_s15 = scalar_lea.hbm %s236_s7, 128 }
 0x13e   :  { %p132_p5 = scmp.ne.s32.totalorder %s236_s7, %s131_s15  ;;  %p135_p6 = scmp.lt.u32.totalorder %s131_s15, %s236_s7 }
 0x140   :  { %p137_p7 = pnand %p135_p6, %p132_p5 }
 0x142   :  { %140 = shalt.err (!%p137_p7)
}
 0x143   :  { %s145_s20 = smov 64   ;;  %s146_s21 = smov 4  }
 0x144   :  { %102 = dma.vmem_to_hbm [thread:$0]  %s97_s14, 128, %s236_s7, [#allocation3], %s145_s20, %s145_s20, %s146_s21  }
 0x145   :  { %141 = dma.done.wait [#allocation3], 128  }
 0x146   :  { %142 = vsyncadd [#allocation3], 4294967168 }
 0x147   :  { %110 = vsyncpa [#allocation3], 1 }

</bundles_post_ra>
